<compile_context>
chip_gen: v5e
topology: v5e:2x2
jax: 0.10.0
libtpu: 0.0.40
codegen_flags: <defaults>
</compile_context>

<pallas_src>
import functools

import jax
import jax.numpy as jnp
from jax.experimental import pallas as pl
from jax.experimental.pallas import tpu as pltpu


def _torgb_kernel(w_ref, b_ref, x_ref, o_ref, *, cin, cout):
    # w_ref: (Cout, Cin) f32 in SMEM (already scaled by weight_gain)
    # b_ref: (Cout,)     f32 in SMEM
    # x_ref: (1, Cin,  R_TILE, LANE) VMEM block  (sublane=R_TILE, lane=LANE: dense)
    # o_ref: (1, Cout, R_TILE, LANE) VMEM block
    xs = [x_ref[0, c] for c in range(cin)]  # each (R_TILE, LANE), loaded once
    for o in range(cout):
        acc = xs[0] * w_ref[o, 0]
        for c in range(1, cin):
            acc = acc + xs[c] * w_ref[o, c]
        o_ref[0, o] = jnp.clip(acc + b_ref[o], -256.0, 256.0).astype(o_ref.dtype)


def _pick_lane_width(hw):
    # Largest lane width (multiple of 128) that divides HW exactly.
    for lane in (512, 256, 128):
        if hw % lane == 0:
            return lane
    return hw  # fallback: flat HW on the lane axis (full-extent block is legal)


def _pick_row_tile(rows, target_rows):
    # Largest multiple-of-8 divisor of `rows` not exceeding the target
    # (full extent if rows is small / not a multiple of 8).  Exact divisors
    # avoid ragged / masked edge blocks.
    if rows <= 8 or rows % 8 != 0:
        return rows
    cap = max(8, min(target_rows - target_rows % 8, rows))
    for rt in range(cap, 7, -8):
        if rows % rt == 0:
            return rt
    return 8


def _vmem_budget():
    # Per-generation tile / scoped-VMEM budget.
    try:
        info = pltpu.get_tpu_info()
        cap = int(getattr(info, "vmem_capacity_bytes", 64 << 20))
    except Exception:
        cap = 64 << 20  # conservative fallback if the query is unavailable
    if cap >= (96 << 20):
        # v5e / v6e: 128 MiB physical VMEM -> large tiles, 64 MiB scoped limit.
        return 512 * 1024, 64 << 20
    # v7x (64 MiB physical) or unknown: smaller tiles, 40 MiB scoped limit.
    return 256 * 1024, 40 << 20


def torgb_layer1(x, _w_latent, weight, bias, weight_gain):
    """x: (N, Cin, H, W) f32; weight: (Cout, Cin, 1, 1); bias: (Cout,).

    Matches ToRGBLayer1.forward: 1x1 conv with weight*weight_gain, bias add,
    clamp to [-256, 256].  `_w_latent` is accepted and ignored (as in PyTorch).
    """
    N, Cin, H, W = x.shape
    Cout = weight.shape[0]
    HW = H * W

    # Lane/sublane-dense layout: HW -> (rows, lane), lane % 128 == 0.
    lane = _pick_lane_width(HW)
    rows = HW // lane

    target_elems, vmem_limit = _vmem_budget()
    target_rows = max(1, target_elems // lane)
    # Keep at least 2 grid blocks when N == 1 so both v7x TensorCores get work.
    if N == 1 and rows >= 16:
        target_rows = min(target_rows, rows // 2)
    r_tile = _pick_row_tile(rows, target_rows)

    # Layout plumbing: pure reshapes (no transposes).
    x4 = x.reshape(N, Cin, rows, lane)
    w2d = (weight.reshape(Cout, Cin) * weight_gain).astype(jnp.float32)
    b1 = bias.astype(jnp.float32)

    grid = (N, rows // r_tile)
    kernel = functools.partial(_torgb_kernel, cin=Cin, cout=Cout)

    cost = pl.CostEstimate(
        flops=2 * N * Cout * Cin * HW,
        transcendentals=0,
        bytes_accessed=N * (Cin + Cout) * HW * x.dtype.itemsize,
    )

    out4 = pl.pallas_call(
        kernel,
        out_shape=jax.ShapeDtypeStruct((N, Cout, rows, lane), x.dtype),
        grid_spec=pltpu.PrefetchScalarGridSpec(
            num_scalar_prefetch=0,
            grid=grid,
            in_specs=[
                # Tiny scaled weights / bias stay resident in SMEM.
                pl.BlockSpec(memory_space=pltpu.MemorySpace.SMEM),
                pl.BlockSpec(memory_space=pltpu.MemorySpace.SMEM),
                # Dense (R_TILE, lane) spatial tile per (batch, row-block).
                pl.BlockSpec((1, Cin, r_tile, lane), lambda n, r: (n, 0, r, 0)),
            ],
            out_specs=pl.BlockSpec((1, Cout, r_tile, lane), lambda n, r: (n, 0, r, 0)),
        ),
        compiler_params=pltpu.CompilerParams(
            dimension_semantics=("parallel", "parallel"),
            vmem_limit_bytes=vmem_limit,
        ),
        cost_estimate=cost,
    )(w2d, b1, x4)

    return out4.reshape(N, Cout, H, W)


if __name__ == "__main__":
    # Small shapes consistent with the module's forward.
    N, Cin, H, W = 2, 4, 16, 16
    Cout, w_dim, ksize = 3, 8, 1

    key = jax.random.PRNGKey(0)
    kx, kw, kl = jax.random.split(key, 3)

    x = jax.random.normal(kx, (N, Cin, H, W), dtype=jnp.float32) * 64.0
    w_latent = jax.random.normal(kl, (N, w_dim), dtype=jnp.float32)  # unused (as in PyTorch)

    # Deterministic parameter init matching __init__ shapes: randn weight, zero bias.
    weight = jax.random.normal(kw, (Cout, Cin, ksize, ksize), dtype=jnp.float32)
    bias = jnp.zeros((Cout,), dtype=jnp.float32)
    weight_gain = 1.0 / jnp.sqrt(jnp.float32(Cin * ksize * ksize))

    out = torgb_layer1(x, w_latent, weight, bias, weight_gain)
    out = jax.block_until_ready(out)

    # Reference check in plain JAX (1x1 conv == channel matmul), clamp as in torch.
    ref = jnp.einsum("nchw,oc->nohw", x, weight.reshape(Cout, Cin) * weight_gain)
    ref = jnp.clip(ref + bias[None, :, None, None], -256.0, 256.0)
    assert out.shape == (N, Cout, H, W)
    assert jnp.allclose(out, ref, atol=1e-4, rtol=1e-4)

    print("KERNEL_OK")
</pallas_src>

<mosaic_0001>
module attributes {stable_mosaic.version = 11 : i64} {
  func.func @_torgb_kernel(%arg0: i32, %arg1: i32, %arg2: memref<3x4xf32, #tpu.memory_space<smem>>, %arg3: memref<3xf32, #tpu.memory_space<smem>>, %arg4: memref<1x4x1x256xf32, #tpu.memory_space<vmem>>, %arg5: memref<1x3x1x256xf32, #tpu.memory_space<vmem>>) attributes {dimension_semantics = [#tpu.dimension_semantics<parallel>, #tpu.dimension_semantics<parallel>], iteration_bounds = array<i64: 2, 1>, scalar_prefetch = 0 : i64, scratch_operands = 0 : i64, tpu.core_type = #tpu.core_type<tc>, window_params = [{transform_indices = @transform_0, window_bounds = array<i64: 3, 4>}, {transform_indices = @transform_1, window_bounds = array<i64: 3>}, {transform_indices = @transform_2, window_bounds = array<i64: 1, 4, 1, 256>}, {transform_indices = @transform_3, window_bounds = array<i64: 1, 3, 1, 256>}]} {
    %c0 = arith.constant 0 : index
    %c0_0 = arith.constant 0 : index
    %c0_1 = arith.constant 0 : index
    %c0_2 = arith.constant 0 : index
    %0 = vector.load %arg4[%c0, %c0_0, %c0_1, %c0_2] : memref<1x4x1x256xf32, #tpu.memory_space<vmem>>, vector<1x1x1x256xf32>
    %1 = vector.shape_cast %0 : vector<1x1x1x256xf32> to vector<1x256xf32>
    %c0_3 = arith.constant 0 : index
    %c1 = arith.constant 1 : index
    %c0_4 = arith.constant 0 : index
    %c0_5 = arith.constant 0 : index
    %2 = vector.load %arg4[%c0_3, %c1, %c0_4, %c0_5] : memref<1x4x1x256xf32, #tpu.memory_space<vmem>>, vector<1x1x1x256xf32>
    %3 = vector.shape_cast %2 : vector<1x1x1x256xf32> to vector<1x256xf32>
    %c0_6 = arith.constant 0 : index
    %c2 = arith.constant 2 : index
    %c0_7 = arith.constant 0 : index
    %c0_8 = arith.constant 0 : index
    %4 = vector.load %arg4[%c0_6, %c2, %c0_7, %c0_8] : memref<1x4x1x256xf32, #tpu.memory_space<vmem>>, vector<1x1x1x256xf32>
    %5 = vector.shape_cast %4 : vector<1x1x1x256xf32> to vector<1x256xf32>
    %c0_9 = arith.constant 0 : index
    %c3 = arith.constant 3 : index
    %c0_10 = arith.constant 0 : index
    %c0_11 = arith.constant 0 : index
    %6 = vector.load %arg4[%c0_9, %c3, %c0_10, %c0_11] : memref<1x4x1x256xf32, #tpu.memory_space<vmem>>, vector<1x1x1x256xf32>
    %7 = vector.shape_cast %6 : vector<1x1x1x256xf32> to vector<1x256xf32>
    %c0_12 = arith.constant 0 : index
    %c0_13 = arith.constant 0 : index
    %8 = memref.load %arg2[%c0_12, %c0_13] : memref<3x4xf32, #tpu.memory_space<smem>>
    %9 = vector.broadcast %8 : f32 to vector<1x256xf32>
    %10 = arith.mulf %1, %9 : vector<1x256xf32>
    %c0_14 = arith.constant 0 : index
    %c1_15 = arith.constant 1 : index
    %11 = memref.load %arg2[%c0_14, %c1_15] : memref<3x4xf32, #tpu.memory_space<smem>>
    %12 = vector.broadcast %11 : f32 to vector<1x256xf32>
    %13 = arith.mulf %3, %12 : vector<1x256xf32>
    %14 = arith.addf %10, %13 : vector<1x256xf32>
    %c0_16 = arith.constant 0 : index
    %c2_17 = arith.constant 2 : index
    %15 = memref.load %arg2[%c0_16, %c2_17] : memref<3x4xf32, #tpu.memory_space<smem>>
    %16 = vector.broadcast %15 : f32 to vector<1x256xf32>
    %17 = arith.mulf %5, %16 : vector<1x256xf32>
    %18 = arith.addf %14, %17 : vector<1x256xf32>
    %c0_18 = arith.constant 0 : index
    %c3_19 = arith.constant 3 : index
    %19 = memref.load %arg2[%c0_18, %c3_19] : memref<3x4xf32, #tpu.memory_space<smem>>
    %20 = vector.broadcast %19 : f32 to vector<1x256xf32>
    %21 = arith.mulf %7, %20 : vector<1x256xf32>
    %22 = arith.addf %18, %21 : vector<1x256xf32>
    %c0_20 = arith.constant 0 : index
    %23 = memref.load %arg3[%c0_20] : memref<3xf32, #tpu.memory_space<smem>>
    %24 = vector.broadcast %23 : f32 to vector<1x256xf32>
    %25 = arith.addf %22, %24 : vector<1x256xf32>
    %cst = arith.constant -2.560000e+02 : f32
    %cst_21 = arith.constant 2.560000e+02 : f32
    %26 = vector.broadcast %cst : f32 to vector<1x256xf32>
    %27 = arith.maximumf %26, %25 : vector<1x256xf32>
    %28 = vector.broadcast %cst_21 : f32 to vector<1x256xf32>
    %29 = arith.minimumf %28, %27 : vector<1x256xf32>
    %c0_22 = arith.constant 0 : index
    %c0_23 = arith.constant 0 : index
    %c0_24 = arith.constant 0 : index
    %c0_25 = arith.constant 0 : index
    %30 = vector.load %arg5[%c0_22, %c0_23, %c0_24, %c0_25] : memref<1x3x1x256xf32, #tpu.memory_space<vmem>>, vector<1x1x1x256xf32>
    %31 = vector.shape_cast %30 : vector<1x1x1x256xf32> to vector<1x256xf32>
    %32 = vector.shape_cast %29 : vector<1x256xf32> to vector<1x1x1x256xf32>
    tpu.vector_store %arg5[%c0_22, %c0_23, %c0_24, %c0_25], %32 {strides = array<i32>} : memref<1x3x1x256xf32, #tpu.memory_space<vmem>>, vector<1x1x1x256xf32>,
    %c1_26 = arith.constant 1 : index
    %c0_27 = arith.constant 0 : index
    %33 = memref.load %arg2[%c1_26, %c0_27] : memref<3x4xf32, #tpu.memory_space<smem>>
    %34 = vector.broadcast %33 : f32 to vector<1x256xf32>
    %35 = arith.mulf %1, %34 : vector<1x256xf32>
    %c1_28 = arith.constant 1 : index
    %c1_29 = arith.constant 1 : index
    %36 = memref.load %arg2[%c1_28, %c1_29] : memref<3x4xf32, #tpu.memory_space<smem>>
    %37 = vector.broadcast %36 : f32 to vector<1x256xf32>
    %38 = arith.mulf %3, %37 : vector<1x256xf32>
    %39 = arith.addf %35, %38 : vector<1x256xf32>
    %c1_30 = arith.constant 1 : index
    %c2_31 = arith.constant 2 : index
    %40 = memref.load %arg2[%c1_30, %c2_31] : memref<3x4xf32, #tpu.memory_space<smem>>
    %41 = vector.broadcast %40 : f32 to vector<1x256xf32>
    %42 = arith.mulf %5, %41 : vector<1x256xf32>
    %43 = arith.addf %39, %42 : vector<1x256xf32>
    %c1_32 = arith.constant 1 : index
    %c3_33 = arith.constant 3 : index
    %44 = memref.load %arg2[%c1_32, %c3_33] : memref<3x4xf32, #tpu.memory_space<smem>>
    %45 = vector.broadcast %44 : f32 to vector<1x256xf32>
    %46 = arith.mulf %7, %45 : vector<1x256xf32>
    %47 = arith.addf %43, %46 : vector<1x256xf32>
    %c1_34 = arith.constant 1 : index
    %48 = memref.load %arg3[%c1_34] : memref<3xf32, #tpu.memory_space<smem>>
    %49 = vector.broadcast %48 : f32 to vector<1x256xf32>
    %50 = arith.addf %47, %49 : vector<1x256xf32>
    %cst_35 = arith.constant -2.560000e+02 : f32
    %cst_36 = arith.constant 2.560000e+02 : f32
    %51 = vector.broadcast %cst_35 : f32 to vector<1x256xf32>
    %52 = arith.maximumf %51, %50 : vector<1x256xf32>
    %53 = vector.broadcast %cst_36 : f32 to vector<1x256xf32>
    %54 = arith.minimumf %53, %52 : vector<1x256xf32>
    %c0_37 = arith.constant 0 : index
    %c1_38 = arith.constant 1 : index
    %c0_39 = arith.constant 0 : index
    %c0_40 = arith.constant 0 : index
    %55 = vector.load %arg5[%c0_37, %c1_38, %c0_39, %c0_40] : memref<1x3x1x256xf32, #tpu.memory_space<vmem>>, vector<1x1x1x256xf32>
    %56 = vector.shape_cast %55 : vector<1x1x1x256xf32> to vector<1x256xf32>
    %57 = vector.shape_cast %54 : vector<1x256xf32> to vector<1x1x1x256xf32>
    tpu.vector_store %arg5[%c0_37, %c1_38, %c0_39, %c0_40], %57 {strides = array<i32>} : memref<1x3x1x256xf32, #tpu.memory_space<vmem>>, vector<1x1x1x256xf32>,
    %c2_41 = arith.constant 2 : index
    %c0_42 = arith.constant 0 : index
    %58 = memref.load %arg2[%c2_41, %c0_42] : memref<3x4xf32, #tpu.memory_space<smem>>
    %59 = vector.broadcast %58 : f32 to vector<1x256xf32>
    %60 = arith.mulf %1, %59 : vector<1x256xf32>
    %c2_43 = arith.constant 2 : index
    %c1_44 = arith.constant 1 : index
    %61 = memref.load %arg2[%c2_43, %c1_44] : memref<3x4xf32, #tpu.memory_space<smem>>
    %62 = vector.broadcast %61 : f32 to vector<1x256xf32>
    %63 = arith.mulf %3, %62 : vector<1x256xf32>
    %64 = arith.addf %60, %63 : vector<1x256xf32>
    %c2_45 = arith.constant 2 : index
    %c2_46 = arith.constant 2 : index
    %65 = memref.load %arg2[%c2_45, %c2_46] : memref<3x4xf32, #tpu.memory_space<smem>>
    %66 = vector.broadcast %65 : f32 to vector<1x256xf32>
    %67 = arith.mulf %5, %66 : vector<1x256xf32>
    %68 = arith.addf %64, %67 : vector<1x256xf32>
    %c2_47 = arith.constant 2 : index
    %c3_48 = arith.constant 3 : index
    %69 = memref.load %arg2[%c2_47, %c3_48] : memref<3x4xf32, #tpu.memory_space<smem>>
    %70 = vector.broadcast %69 : f32 to vector<1x256xf32>
    %71 = arith.mulf %7, %70 : vector<1x256xf32>
    %72 = arith.addf %68, %71 : vector<1x256xf32>
    %c2_49 = arith.constant 2 : index
    %73 = memref.load %arg3[%c2_49] : memref<3xf32, #tpu.memory_space<smem>>
    %74 = vector.broadcast %73 : f32 to vector<1x256xf32>
    %75 = arith.addf %72, %74 : vector<1x256xf32>
    %cst_50 = arith.constant -2.560000e+02 : f32
    %cst_51 = arith.constant 2.560000e+02 : f32
    %76 = vector.broadcast %cst_50 : f32 to vector<1x256xf32>
    %77 = arith.maximumf %76, %75 : vector<1x256xf32>
    %78 = vector.broadcast %cst_51 : f32 to vector<1x256xf32>
    %79 = arith.minimumf %78, %77 : vector<1x256xf32>
    %c0_52 = arith.constant 0 : index
    %c2_53 = arith.constant 2 : index
    %c0_54 = arith.constant 0 : index
    %c0_55 = arith.constant 0 : index
    %80 = vector.load %arg5[%c0_52, %c2_53, %c0_54, %c0_55] : memref<1x3x1x256xf32, #tpu.memory_space<vmem>>, vector<1x1x1x256xf32>
    %81 = vector.shape_cast %80 : vector<1x1x1x256xf32> to vector<1x256xf32>
    %82 = vector.shape_cast %79 : vector<1x256xf32> to vector<1x1x1x256xf32>
    tpu.vector_store %arg5[%c0_52, %c2_53, %c0_54, %c0_55], %82 {strides = array<i32>} : memref<1x3x1x256xf32, #tpu.memory_space<vmem>>, vector<1x1x1x256xf32>,
    return
  }
  func.func @transform_0(%arg0: i32, %arg1: i32) -> (i32, i32) {
    %c0_i32 = arith.constant 0 : i32
    %c0_i32_0 = arith.constant 0 : i32
    %c0_i32_1 = arith.constant 0 : i32
    return %c0_i32, %c0_i32_0 : i32, i32
  }
  func.func @transform_1(%arg0: i32, %arg1: i32) -> i32 {
    %c0_i32 = arith.constant 0 : i32
    %c0_i32_0 = arith.constant 0 : i32
    return %c0_i32 : i32
  }
  func.func @transform_2(%arg0: i32, %arg1: i32) -> (i32, i32, i32, i32) {
    %c0_i32 = arith.constant 0 : i32
    %c0_i32_0 = arith.constant 0 : i32
    %c0_i32_1 = arith.constant 0 : i32
    return %arg0, %c0_i32, %arg1, %c0_i32_0 : i32, i32, i32, i32
  }
  func.func @transform_3(%arg0: i32, %arg1: i32) -> (i32, i32, i32, i32) {
    %c0_i32 = arith.constant 0 : i32
    %c0_i32_0 = arith.constant 0 : i32
    %c0_i32_1 = arith.constant 0 : i32
    return %arg0, %c0_i32, %arg1, %c0_i32_0 : i32, i32, i32, i32
  }
}

</mosaic_0001>

<bundles_post_ra>
// kernel: tpu_custom_call.1
= control target key start
LH: loop header
LB: loop body
LE: loop exit
PB: predicated region body
PF: predicated region fallthrough
CT: control target
= control target key end

     0   :  { %s912_s0 = inlined_call_operand.hbm [shape: f32[3,4], index: 0, kind: input, shape index: {}]   ;;  %s913_s1 = inlined_call_operand.hbm [shape: f32[3], index: 1, kind: input, shape index: {}]   ;;  %s914_s2 = inlined_call_operand.hbm [shape: f32[2,4,1,256], index: 2, kind: input, shape index: {}]   ;;  %s915_s3 = inlined_call_operand.hbm [shape: f32[2,3,1,256], index: 3, kind: output, shape index: {}]  }
   0x1   :  { %916 = sst [smem:[#allocation14_spill]] %s912_s0 }
   0x2   :  { %8 = vsyncpa [#allocation5], 0 }
   0x3   :  { %9 = vsyncpa [#allocation7], 0 }
   0x4   :  { %10 = vsyncpa [#allocation3], 0 }
   0x5   :  { %12 = vsyncpa [#allocation3 + $0x1], 0 }
   0x6   :  { %13 = vsyncpa [#allocation4], 0 }
   0x7   :  { %15 = vsyncpa [#allocation4 + $0x1], 0  ;;  %s737_s12 = smov 0   ;;  %s739_s13 = smov 0  }
   0x8   :  { %s741_s14 = smov 0   ;;  %s743_s15 = smov 0  }
   0x9   :  { %s745_s16 = smov 0   ;;  %s747_s17 = smov 0  }
   0xa LB: > { %s435_s18 = sadd.s32 4294967295, %s709_s17   ;;  %s436_s19 = sadd.s32 4294967294, %s709_s17   ;;  %s709_s17 = sphi %s747_s17, %s21_s17   ;;  %s705_s16 = sphi %s745_s16, %s931_s16   ;;  %s701_s15 = sphi %s743_s15, %s930_s15   ;;  %s697_s14 = sphi %s741_s14, %s929_s14   ;;  %s693_s13 = sphi %s739_s13, %s928_s13   ;;  %s689_s12 = sphi %s737_s12, %s927_s12  }
   0xb   : > { %s84_s20 = sadd.s32 1, %s697_s14  ;;  %p91_p0 = scmp.ne.s32.totalorder %s697_s14, %s693_s13 }
   0xc   : > { %p92_p1 = scmp.eq.s32.totalorder %s709_s17, 0  ;;  %p97_p2 = scmp.ne.s32.totalorder %s693_s13, %s689_s12 }
   0xd   : > { %p775_p3 = scmp.eq.s32.totalorder %s435_s18, 0  ;;  %p123_p4 = scmp.eq.s32.totalorder %s435_s18, 1 }
   0xe   : > { %p779_p5 = por %p92_p1, %p91_p0  ;;  %p129_p6 = scmp.eq.s32.totalorder %s436_s19, 1 }
   0xf   : > { %p785_p7 = por %p775_p3, %p97_p2  ;;  %p789_p8 = por %p123_p4, %p91_p0 }
  0x10   : > { %p793_p9 = por %p129_p6, %p97_p2  ;;  %p437_p10 = scmp.ge.s32.totalorder %s709_s17, 1 }
  0x11   : > { %p136_p11 = scmp.lt.s32.totalorder %s709_s17, 3  ;;  %s922_s0 = sld [smem:[#allocation14_spill]] }
  0x12   : > { %p440_p13 = scmp.ge.s32.totalorder %s709_s17, 2  ;;  %p501_p0 = scmp.lt.s32.totalorder %s709_s17, 2 }
  0x13   : > { %p802_p12 = pnand %p437_p10, %p136_p11  ;;  %s158_s5 = sshll.u32 %s913_s1, 4  ;;  %s159_s5 = int_to_ptr.hbm [resolvable:$true] %s158_s5 }
  0x14   : > { %p815_p2 = pnand %p501_p0, %p779_p5  ;;  %s711_s7 = smov [#allocation2]  }
  0x15   : > { %p484_p1 = pneg %p802_p12  ;;  %s712_s8 = smov [#allocation6]  }
  0x16   : > { %s33_s9 = sadd.s32 1, %s705_s16  ;;  %s169_s10 = sand.u32 1, %s697_s14  }
  0x17   : > { %s148_s28 = sshll.u32 %s922_s0, 4  ;;  %p485_p4 = pnand %p484_p1, %p775_p3  ;;  %s149_s28 = int_to_ptr.hbm [resolvable:$true] %s148_s28 }
  0x18   : > { %p35_p6 = scmp.ge.s32.totalorder %s33_s9, 2  ;;  %s441_s11 = sshll.u32 %s169_s10, 3 }
  0x19   : > { %487 = dma.hbm_to_smem (!%p485_p4), %s149_s28, 64, %s711_s7, [#allocation5]  }
  0x1a   : > { %490 = dma.hbm_to_smem (!%p485_p4), %s159_s5, 16, %s712_s8, [#allocation7]  }
  0x1b   : > { %s442_s18 = sshll.u32 %s705_s16, 3  ;;  %s933_s9 = smov (%p35_p6, %s33_s9), 0 }
  0x1c   : > { %s179_s26 = scalar_lea.hbm %s914_s2, %s442_s18  ;;  %s79_s27 = ssub.s32 %s705_s16, %s933_s9 }
  0x1d   : > { %s180_s30 = sshll.u32 %s179_s26, 4  ;;  %p82_p5 = scmp.eq.s32.totalorder %s79_s27, 0  ;;  %s181_s30 = int_to_ptr.hbm [resolvable:$true] %s180_s30 }
  0x1e   : > { %s173_s28 = scalar_lea.vmem [#allocation8], %s441_s11  ;;  %s170_s7 = scalar_lea.sflag [#allocation3], %s169_s10 }
  0x1f   : > { %s182_s4 = sshll.u32 %s173_s28, 4  ;;  %s713_s8 = smov 32   ;;  %s183_s4 = int_to_ptr.vmem [resolvable:$true] %s182_s4 }
  0x20   : > { %s834_s5 = scalar_select %p82_p5, %s697_s14, %s84_s20  }
  0x21   : > { %s714_s0 = smov 2   ;;  %194 = sbr.rel (%p802_p12) target bundleno = 81 (0x51), region = 32 }
  0x22   : > { %494 = dma.hbm_to_vmem [thread:$0]  (!%p815_p2), %s181_s30, 128, %s183_s4, %s170_s7, %s713_s8, %s713_s8, %s714_s0  }
  0x26   : > { %672 = dma.done.wait (%p775_p3), [#allocation5], 64  }
  0x27   : > { %674 = vsyncadd (%p775_p3), [#allocation5], 4294967232 }
  0x28   : > { %676 = dma.done.wait (%p775_p3), [#allocation7], 16  }
  0x29   : > { %678 = vsyncadd (%p775_p3), [#allocation7], 4294967280  ;;  %s849_s20 = sand.u32 1, %s693_s13  }
  0x2a   : > { %s446_s0 = sshll.u32 %s849_s20, 3  ;;  %s207_s29 = scalar_lea.sflag [#allocation3], %s849_s20 }
  0x2b   : > { %s210_s6 = scalar_lea.vmem [#allocation8], %s446_s0 }
  0x2c   : > { %680 = dma.done.wait (%p785_p7), %s207_s29, 128  }
  0x2d   : > { %682 = vsyncadd (%p785_p7), %s207_s29, 4294967168 }
  0x2e   : > { %216 = sfence }
  0x2f   : > { %s242_s10 = sld [smem:[#allocation2]]  ;;  %v235_v0 = vld [vmem:[%s210_s6] sm:$0x3]  ;;  %v447_v1 = vld [vmem:[%s210_s6 + $0x2] sm:$0x3]  ;;  %s470_s8 = smul.u32 6, %s849_s20  ;;  %v262_v18 = vlaneseq }
  0x30   : > { %s450_s11 = sld [smem:[#allocation2 + $0x1]]  ;;  %v448_v2 = vld [vmem:[%s210_s6 + $0x4] sm:$0x3]  ;;  %v449_v4 = vld [vmem:[%s210_s6 + $0x6] sm:$0x3]  ;;  %s471_s6 = smul.u32 6, %s701_s15 }
  0x31   : > { %s451_s18 = sld [smem:[#allocation2 + $0x2]]  ;;  %vm863_vm0 = vcmp.lt.s32.totalorder %v262_v18, 256 }
  0x32   : > { %s452_s21 = sld [smem:[#allocation2 + $0x3]] }
  0x33   : > { %s857_s19 = sld [smem:[#allocation6]] }
  0x34   : > { %s454_s22 = sld [smem:[#allocation2 + $0x80]] }
  0x35   : > { %v243_v3 = vstv %s242_s10  ;;  %s455_s26 = sld [smem:[#allocation2 + $0x81]]  ;;  %s234_s10 = scalar_lea.vmem [#allocation9], %s470_s8 }
  0x36   : > { %v244_v5 = vmul.f32 %v243_v3, %v235_v0  ;;  %v246_v6 = vstv %s450_s11  ;;  %s456_s27 = sld [smem:[#allocation2 + $0x82]]  ;;  %s325_s15 = sshll.u32 %s234_s10, 4  ;;  %s326_s15 = int_to_ptr.vmem [resolvable:$true] %s325_s15 }
  0x37   : > { %v247_v7 = vmul.f32 %v447_v1, %v246_v6  ;;  %v250_v8 = vstv %s451_s18  ;;  %s457_s23 = sld [smem:[#allocation2 + $0x83]] }
  0x38   : > { %v251_v9 = vmul.f32 %v448_v2, %v250_v8  ;;  %v254_v10 = vstv %s452_s21  ;;  %s859_s30 = sld [smem:[#allocation6 + $0x1]]  ;;  %s324_s21 = scalar_lea.hbm %s915_s3, %s471_s6 }
  0x39   : > { %v248_v11 = vadd.f32 %v247_v7, %v244_v5  ;;  %v255_v12 = vmul.f32 %v449_v4, %v254_v10  ;;  %s461_s28 = sld [smem:[#allocation2 + $0x100]]  ;;  %v258_v17 = vstv %s857_s19  ;;  %s327_s19 = sshll.u32 %s324_s21, 4  ;;  %s328_s19 = int_to_ptr.hbm [resolvable:$true] %s327_s19 }
  0x3a   : > { %v268_v13 = vstv %s454_s22  ;;  %s462_s4 = sld [smem:[#allocation2 + $0x101]]  ;;  %s312_s22 = scalar_lea.sflag [#allocation4], %s849_s20 }
  0x3b   : > { %v252_v14 = vadd.f32 %v251_v9, %v248_v11  ;;  %v269_v15 = vmul.f32 %v268_v13, %v235_v0  ;;  %v271_v16 = vstv %s455_s26  ;;  %s463_s7 = sld [smem:[#allocation2 + $0x102]]  ;;  %s633_s26 = sshra.s32 %s328_s19, 4  ;;  %s634_s26 = int_to_ptr.hbm [resolvable:$true] %s633_s26 }
  0x3c   : > { %v272_v19 = vmul.f32 %v447_v1, %v271_v16  ;;  %v275_v20 = vstv %s456_s27  ;;  %s464_s0 = sld [smem:[#allocation2 + $0x103]]  ;;  %s635_s27 = scalar_lea.hbm %s634_s26, 6 }
  0x3d   : > { %v256_v21 = vadd.f32 %v255_v12, %v252_v14  ;;  %v276_v22 = vmul.f32 %v448_v2, %v275_v20  ;;  %v279_v23 = vstv %s457_s23  ;;  %s465_s29 = sld [smem:[#allocation6 + $0x2]]  ;;  %p636_p3 = scmp.ne.s32.totalorder %s634_s26, %s635_s27 }
  0x3e   : > { %v273_v24 = vadd.f32 %v272_v19, %v269_v15  ;;  %v280_v25 = vmul.f32 %v449_v4, %v279_v23  ;;  %v283_v33 = vstv %s859_s30  ;;  %p640_p11 = scmp.lt.s32.totalorder %s634_s26, %s915_s3 }
  0x3f   : > { %v259_v26 = vadd.f32 %v258_v17, %v256_v21  ;;  %v290_v27 = vstv %s461_s28  ;;  %p637_p7 = pnand %p636_p3, %p789_p8  ;;  %s639_s28 = scalar_lea.hbm %s915_s3, 12 }
  0x40   : > { %v277_v29 = vadd.f32 %v276_v22, %v273_v24  ;;  %v291_v30 = vmul.f32 %v290_v27, %v235_v0  ;;  %v293_v31 = vstv %s462_s4  ;;  %p641_p12 = scmp.lt.s32.totalorder %s639_s28, %s635_s27 }
  0x41   : > { %v453_v32 = vclamps-f32 %v259_v26, 256.0  ;;  %v294_v34 = vmul.f32 %v447_v1, %v293_v31  ;;  %v297_v35 = vstv %s463_s7  ;;  %p638_p10 = pneg %p637_p7 }
  0x42   : > { %v281_v36 = vadd.f32 %v280_v25, %v277_v29  ;;  %v298_v37 = vmul.f32 %v448_v2, %v297_v35  ;;  %v301_v38 = vstv %s464_s0  ;;  %p642_p0 = por %p641_p12, %p640_p11 }
  0x43   : > { %266 = vst.msk [vmem:[%s234_s10] sm:$0x3] %vm863_vm0, %v453_v32  ;;  %v295_v39 = vadd.f32 %v294_v34, %v291_v30  ;;  %v302_v40 = vmul.f32 %v449_v4, %v301_v38  ;;  %v305_v44 = vstv %s465_s29 }
  0x44   : > { %v284_v41 = vadd.f32 %v283_v33, %v281_v36  ;;  %p643_p1 = pnand %p642_p0, %p638_p10 }
  0x45   : > { %v299_v42 = vadd.f32 %v298_v37, %v295_v39 }
  0x46   : > { %v459_v43 = vclamps-f32 %v284_v41, 256.0 }
  0x47   : > { %v303_v45 = vadd.f32 %v302_v40, %v299_v42 }
  0x48   : > { %460 = vst.msk [vmem:[%s234_s10 + $0x2] sm:$0x3] %vm863_vm0, %v459_v43 }
  0x49   : > { %v306_v46 = vadd.f32 %v305_v44, %v303_v45 }
  0x4b   : > { %v466_v47 = vclamps-f32 %v306_v46, 256.0 }
  0x4d   : > { %467 = vst.msk [vmem:[%s234_s10 + $0x4] sm:$0x3] %vm863_vm0, %v466_v47 }
  0x4e   : > { %646 = shalt.err (!%p643_p1)
}
  0x4f   : > { %s715_s20 = smov 32   ;;  %s716_s8 = smov 2  }
  0x50   : > { %482 = dma.vmem_to_hbm [thread:$0]  (%p789_p8), %s326_s15, 96, %s328_s19, %s312_s22, %s715_s20, %s715_s20, %s716_s8  }
  0x51 PF: > { %s342_s0 = sand.u32 1, %s689_s12   ;;  %p496_p2 = pnand %p440_p13, %p793_p9 }
  0x52   : > { %s343_s29 = scalar_lea.sflag [#allocation4], %s342_s0 }
  0x53   : > { %p497_p4 = pneg %p496_p2 }
  0x55   : > { %684 = dma.done.wait (%p497_p4), %s343_s29, 96  }
  0x56   : > { %686 = vsyncadd (%p497_p4), %s343_s29, 4294967200  ;;  %s21_s17 = sadd.s32 1, %s709_s17   ;;  %s927_s12 = smov %s693_s13 }
  0x57   : > { %p18_p6 = scmp.ge.s32.totalorder %s21_s17, 4   ;;  %s928_s13 = smov %s697_s14 }
  0x58   : > { %s929_s14 = smov %s834_s5  ;;  %s930_s15 = smov %s705_s16 }
  0x59   : > { %s931_s16 = smov %s933_s9  ;;  %20 = sbr.rel (!%p18_p6) target bundleno = 10 (0xa), region = 91 }
  0x5e   :  { %349 = vsyncpa [#allocation3], 1 }
  0x5f   :  { %351 = vsyncpa [#allocation3 + $0x1], 1 }
  0x60   :  { %352 = vsyncpa [#allocation4], 1 }
  0x61   :  { %354 = vsyncpa [#allocation4 + $0x1], 1 }
  0x62   :  { %355 = vsyncpa [#allocation5], 1 }
  0x63   :  { %357 = vsyncpa [#allocation5 + $0x1], 1 }
  0x64   :  { %358 = vsyncpa [#allocation7], 1 }

</bundles_post_ra>
